<compile_context>
chip_gen: v5e
topology: v5e:2x2
jax: 0.10.0
libtpu: 0.0.40
codegen_flags: <defaults>
</compile_context>

<pallas_src>
import functools

import jax
import jax.numpy as jnp
from jax.experimental import pallas as pl
from jax.experimental.pallas import tpu as pltpu

_LANE = 128      # lane-dense padding granularity
_SUBLANE = 8
_MAX_TB = 512    # batch tile upper bound (~85% of HBM roofline at 512-row tiles)


def _round_up(n, m):
    return ((n + m - 1) // m) * m


def _fused_mlp_kernel(*refs, n_layers):
    """refs = (x_ref, w0, b0, w1, b1, ..., w_{L-1}, b_{L-1}, o_ref).

    x_ref : (tb, F0p)       f32 or bf16 VMEM
    w_i   : (Fin_p, Fout_p) bf16 VMEM (pre-transposed + zero-padded)
    b_i   : (1, Fout_p)     f32 VMEM (zero-padded)
    o_ref : (tb, FLp)       f32 VMEM
    """
    x_ref = refs[0]
    o_ref = refs[-1]
    wb_refs = refs[1:-1]

    h = x_ref[...]
    if h.dtype != jnp.bfloat16:
        h = h.astype(jnp.bfloat16)          # bf16 MXU fast path; f32 accumulation below
    for li in range(n_layers):
        w = wb_refs[2 * li][...]            # bf16 (Fin_p, Fout_p)
        b = wb_refs[2 * li + 1][...]        # f32  (1, Fout_p)
        y = jnp.dot(h, w, preferred_element_type=jnp.float32) + b   # f32
        if li == n_layers - 1:
            h = jax.nn.sigmoid(y)           # EUP exp + reciprocal, stays f32
        else:
            # LeakyReLU(0.01): mul+max; downcast immediately so the live activation is bf16.
            h = jnp.maximum(y, 0.01 * y).astype(jnp.bfloat16)
    o_ref[...] = h.astype(o_ref.dtype)


def fused_mlp_forward(x, padded_params, output_size):
    """x: (B, F0) f32 or bf16. padded_params: list of (w bf16 (Fin_p,Fout_p), b f32 (1,Fout_p))."""
    B, F0 = x.shape
    F0p = padded_params[0][0].shape[0]
    FLp = padded_params[-1][0].shape[1]
    n_layers = len(padded_params)

    # ---- batch tiling ------------------------------------------------------
    Bp = _round_up(max(B, _SUBLANE), _SUBLANE)
    tb = min(_MAX_TB, Bp)
    # v7x megacore: ensure >= 2 grid steps on the "parallel" axis for large batches.
    if Bp > 256:
        tb = min(tb, _round_up((Bp + 1) // 2, _SUBLANE))
    Bp = _round_up(Bp, tb)

    # ---- input: avoid an extra HBM pass unless padding is actually required --
    needs_pad = (F0 != F0p) or (Bp != B)
    if needs_pad:
        # pad + cast in one XLA op; writing bf16 halves the extra pass's HBM bytes.
        xp = jnp.zeros((Bp, F0p), jnp.bfloat16).at[:B, :F0].set(x.astype(jnp.bfloat16))
    else:
        xp = x  # streamed as-is; kernel casts tiles to bf16 on the fly if needed

    flat_wb = []
    for w_pad, b_pad in padded_params:
        flat_wb.append(w_pad)
        flat_wb.append(b_pad)

    # ---- explicit VMEM budget ------------------------------------------------
    x_itemsize = jnp.dtype(xp.dtype).itemsize
    max_fp = max([F0p] + [w.shape[1] for w, _ in padded_params])
    vmem_needed = (
        2 * tb * F0p * x_itemsize                                        # x tile, 2 buffers
        + 2 * tb * FLp * 4                                               # out tile f32, 2 buffers
        + sum(w.shape[0] * w.shape[1] * 2 for w, _ in padded_params)     # bf16 weights, 1 buffer
        + sum(_SUBLANE * b.shape[1] * 4 for _, b in padded_params)       # biases (sublane padded)
        + 4 * tb * max_fp * 4                                            # live activations/headroom
    )
    vmem_limit = min(max(int(vmem_needed * 1.5) + (4 << 20), 16 << 20), 56 << 20)

    kernel = functools.partial(_fused_mlp_kernel, n_layers=n_layers)

    def _run(weight_pipeline_mode):
        in_specs = [pl.BlockSpec((tb, F0p), lambda i: (i, 0))]
        for w_pad, b_pad in padded_params:
            kw = {} if weight_pipeline_mode is None else {"pipeline_mode": weight_pipeline_mode}
            in_specs.append(pl.BlockSpec(w_pad.shape, lambda i: (0, 0), **kw))
            in_specs.append(pl.BlockSpec(b_pad.shape, lambda i: (0, 0), **kw))
        return pl.pallas_call(
            kernel,
            out_shape=jax.ShapeDtypeStruct((Bp, FLp), jnp.float32),
            grid=(Bp // tb,),
            in_specs=in_specs,
            out_specs=pl.BlockSpec((tb, FLp), lambda i: (i, 0)),
            compiler_params=pltpu.CompilerParams(
                dimension_semantics=("parallel",),
                vmem_limit_bytes=vmem_limit,
            ),
        )(xp, *flat_wb)

    try:
        # Grid-invariant weights/biases: a single VMEM buffer is enough.
        out = _run(pl.Buffered(1))
    except Exception:
        # TODO(synk): some jax versions reject pipeline_mode on the auto-pipelined path;
        # fall back to default double-buffering (correct, just uses more VMEM).
        out = _run(None)

    if Bp == B and FLp == output_size:
        return out
    # NOTE: the narrow column slice is lane-sparse in XLA; for large pipelines prefer keeping
    # the padded width for the next consumer and slicing rows only.
    return out[:B, :output_size]


class MLPPallas:
    """Mirror of the PyTorch MLP: hidden Linear+LeakyReLU layers, final Linear+Sigmoid."""

    def __init__(self, input_size, output_size, hidden_sizes, key):
        self.output_size = output_size
        self.raw_params = []     # (w (out,in) f32, b (out,) f32) — PyTorch layout, for reference
        self.padded_params = []  # (w_t padded bf16 (Fin_p,Fout_p), b padded f32 (1,Fout_p))

        sizes = [input_size] + list(hidden_sizes) + [output_size]
        for li in range(len(sizes) - 1):
            fan_in, fan_out = sizes[li], sizes[li + 1]
            key, kw, kb = jax.random.split(key, 3)
            # nn.Linear default init: U(-1/sqrt(fan_in), 1/sqrt(fan_in))
            bound = 1.0 / jnp.sqrt(jnp.float32(fan_in))
            w = jax.random.uniform(kw, (fan_out, fan_in), jnp.float32, -bound, bound)
            b = jax.random.uniform(kb, (fan_out,), jnp.float32, -bound, bound)
            self.raw_params.append((w, b))

            fin_p = _round_up(fan_in, _LANE)
            fout_p = _round_up(fan_out, _LANE)
            w_t = jnp.transpose(w)  # (in, out)
            w_pad = jnp.zeros((fin_p, fout_p), jnp.float32).at[:fan_in, :fan_out].set(w_t)
            b_pad = jnp.zeros((1, fout_p), jnp.float32).at[0, :fan_out].set(b)
            self.padded_params.append((w_pad.astype(jnp.bfloat16), b_pad))

    def __call__(self, x):
        return fused_mlp_forward(x, self.padded_params, self.output_size)


def _reference_forward(raw_params, x):
    """Pure-JAX f32 reference (PyTorch semantics)."""
    n_layers = len(raw_params)
    for li, (w, b) in enumerate(raw_params):
        y = x @ w.T + b
        if li == n_layers - 1:
            x = jax.nn.sigmoid(y)
        else:
            x = jnp.where(y >= 0, y, 0.01 * y)
    return x


if __name__ == "__main__":
    key = jax.random.PRNGKey(0)
    key, kx, kp = jax.random.split(key, 3)

    batch = 16
    input_size = 32
    hidden_sizes = (64, 32)
    output_size = 8

    x = jax.random.normal(kx, (batch, input_size), jnp.float32)

    mlp = MLPPallas(input_size, output_size, hidden_sizes, kp)

    out = mlp(x)
    out = jax.block_until_ready(out)

    ref = _reference_forward(mlp.raw_params, x)
    assert out.shape == (batch, output_size), out.shape
    # bf16 MXU inputs / bf16 hidden activations with f32 accumulation -> relaxed tolerance.
    assert jnp.allclose(out, ref, atol=2e-2, rtol=2e-2), "Pallas output mismatch vs reference"

    print("KERNEL_OK")
</pallas_src>

<mosaic_0001>
module attributes {stable_mosaic.version = 11 : i64} {
  func.func @_fused_mlp_kernel(%arg0: i32, %arg1: memref<16x128xbf16, #tpu.memory_space<vmem>>, %arg2: memref<128x128xbf16, #tpu.memory_space<vmem>>, %arg3: memref<1x128xf32, #tpu.memory_space<vmem>>, %arg4: memref<128x128xbf16, #tpu.memory_space<vmem>>, %arg5: memref<1x128xf32, #tpu.memory_space<vmem>>, %arg6: memref<128x128xbf16, #tpu.memory_space<vmem>>, %arg7: memref<1x128xf32, #tpu.memory_space<vmem>>, %arg8: memref<16x128xf32, #tpu.memory_space<vmem>>) attributes {dimension_semantics = [#tpu.dimension_semantics<parallel>], iteration_bounds = array<i64: 1>, scalar_prefetch = 0 : i64, scratch_operands = 0 : i64, tpu.core_type = #tpu.core_type<tc>, window_params = [{transform_indices = @transform_0, window_bounds = array<i64: 16, 128>}, {pipeline_mode = #tpu.pipeline_mode<synchronous>, transform_indices = @transform_1, window_bounds = array<i64: 128, 128>}, {pipeline_mode = #tpu.pipeline_mode<synchronous>, transform_indices = @transform_2, window_bounds = array<i64: 1, 128>}, {pipeline_mode = #tpu.pipeline_mode<synchronous>, transform_indices = @transform_3, window_bounds = array<i64: 128, 128>}, {pipeline_mode = #tpu.pipeline_mode<synchronous>, transform_indices = @transform_4, window_bounds = array<i64: 1, 128>}, {pipeline_mode = #tpu.pipeline_mode<synchronous>, transform_indices = @transform_5, window_bounds = array<i64: 128, 128>}, {pipeline_mode = #tpu.pipeline_mode<synchronous>, transform_indices = @transform_6, window_bounds = array<i64: 1, 128>}, {transform_indices = @transform_7, window_bounds = array<i64: 16, 128>}]} {
    %c0 = arith.constant 0 : index
    %c0_0 = arith.constant 0 : index
    %0 = vector.load %arg1[%c0, %c0_0] : memref<16x128xbf16, #tpu.memory_space<vmem>>, vector<16x128xbf16>
    %c0_1 = arith.constant 0 : index
    %c0_2 = arith.constant 0 : index
    %1 = vector.load %arg2[%c0_1, %c0_2] : memref<128x128xbf16, #tpu.memory_space<vmem>>, vector<128x128xbf16>
    %c0_3 = arith.constant 0 : index
    %c0_4 = arith.constant 0 : index
    %2 = vector.load %arg3[%c0_3, %c0_4] : memref<1x128xf32, #tpu.memory_space<vmem>>, vector<1x128xf32>
    %cst = arith.constant dense<0.000000e+00> : vector<16x128xf32>
    %3 = tpu.matmul %0, %1, %cst {dimension_numbers = #tpu.dot_dimension_numbers<[1], [0], [0], [1], [0, 0, 1, 1], [], []>} : vector<16x128xbf16>, vector<128x128xbf16>, vector<16x128xf32> -> vector<16x128xf32>
    %4 = vector.broadcast %2 : vector<1x128xf32> to vector<16x128xf32>
    %5 = arith.addf %3, %4 : vector<16x128xf32>
    %cst_5 = arith.constant 0.00999999977 : f32
    %6 = vector.broadcast %cst_5 : f32 to vector<16x128xf32>
    %7 = arith.mulf %6, %5 : vector<16x128xf32>
    %8 = arith.maximumf %5, %7 : vector<16x128xf32>
    %9 = arith.truncf %8 : vector<16x128xf32> to vector<16x128xbf16>
    %c0_6 = arith.constant 0 : index
    %c0_7 = arith.constant 0 : index
    %10 = vector.load %arg4[%c0_6, %c0_7] : memref<128x128xbf16, #tpu.memory_space<vmem>>, vector<128x128xbf16>
    %c0_8 = arith.constant 0 : index
    %c0_9 = arith.constant 0 : index
    %11 = vector.load %arg5[%c0_8, %c0_9] : memref<1x128xf32, #tpu.memory_space<vmem>>, vector<1x128xf32>
    %cst_10 = arith.constant dense<0.000000e+00> : vector<16x128xf32>
    %12 = tpu.matmul %9, %10, %cst_10 {dimension_numbers = #tpu.dot_dimension_numbers<[1], [0], [0], [1], [0, 0, 1, 1], [], []>} : vector<16x128xbf16>, vector<128x128xbf16>, vector<16x128xf32> -> vector<16x128xf32>
    %13 = vector.broadcast %11 : vector<1x128xf32> to vector<16x128xf32>
    %14 = arith.addf %12, %13 : vector<16x128xf32>
    %cst_11 = arith.constant 0.00999999977 : f32
    %15 = vector.broadcast %cst_11 : f32 to vector<16x128xf32>
    %16 = arith.mulf %15, %14 : vector<16x128xf32>
    %17 = arith.maximumf %14, %16 : vector<16x128xf32>
    %18 = arith.truncf %17 : vector<16x128xf32> to vector<16x128xbf16>
    %c0_12 = arith.constant 0 : index
    %c0_13 = arith.constant 0 : index
    %19 = vector.load %arg6[%c0_12, %c0_13] : memref<128x128xbf16, #tpu.memory_space<vmem>>, vector<128x128xbf16>
    %c0_14 = arith.constant 0 : index
    %c0_15 = arith.constant 0 : index
    %20 = vector.load %arg7[%c0_14, %c0_15] : memref<1x128xf32, #tpu.memory_space<vmem>>, vector<1x128xf32>
    %cst_16 = arith.constant dense<0.000000e+00> : vector<16x128xf32>
    %21 = tpu.matmul %18, %19, %cst_16 {dimension_numbers = #tpu.dot_dimension_numbers<[1], [0], [0], [1], [0, 0, 1, 1], [], []>} : vector<16x128xbf16>, vector<128x128xbf16>, vector<16x128xf32> -> vector<16x128xf32>
    %22 = vector.broadcast %20 : vector<1x128xf32> to vector<16x128xf32>
    %23 = arith.addf %21, %22 : vector<16x128xf32>
    %24 = arith.negf %23 : vector<16x128xf32>
    %25 = math.exp %24 : vector<16x128xf32>
    %cst_17 = arith.constant 1.000000e+00 : f32
    %26 = vector.broadcast %cst_17 : f32 to vector<16x128xf32>
    %27 = arith.addf %26, %25 : vector<16x128xf32>
    %28 = arith.divf %26, %27 : vector<16x128xf32>
    %c0_18 = arith.constant 0 : index
    %c0_19 = arith.constant 0 : index
    %29 = vector.load %arg8[%c0_18, %c0_19] : memref<16x128xf32, #tpu.memory_space<vmem>>, vector<16x128xf32>
    tpu.vector_store %arg8[%c0_18, %c0_19], %28 {strides = array<i32>} : memref<16x128xf32, #tpu.memory_space<vmem>>, vector<16x128xf32>,
    return
  }
  func.func @transform_0(%arg0: i32) -> (i32, i32) {
    %c0_i32 = arith.constant 0 : i32
    %c0_i32_0 = arith.constant 0 : i32
    return %arg0, %c0_i32 : i32, i32
  }
  func.func @transform_1(%arg0: i32) -> (i32, i32) {
    %c0_i32 = arith.constant 0 : i32
    %c0_i32_0 = arith.constant 0 : i32
    %c0_i32_1 = arith.constant 0 : i32
    return %c0_i32, %c0_i32_0 : i32, i32
  }
  func.func @transform_2(%arg0: i32) -> (i32, i32) {
    %c0_i32 = arith.constant 0 : i32
    %c0_i32_0 = arith.constant 0 : i32
    %c0_i32_1 = arith.constant 0 : i32
    return %c0_i32, %c0_i32_0 : i32, i32
  }
  func.func @transform_3(%arg0: i32) -> (i32, i32) {
    %c0_i32 = arith.constant 0 : i32
    %c0_i32_0 = arith.constant 0 : i32
    %c0_i32_1 = arith.constant 0 : i32
    return %c0_i32, %c0_i32_0 : i32, i32
  }
  func.func @transform_4(%arg0: i32) -> (i32, i32) {
    %c0_i32 = arith.constant 0 : i32
    %c0_i32_0 = arith.constant 0 : i32
    %c0_i32_1 = arith.constant 0 : i32
    return %c0_i32, %c0_i32_0 : i32, i32
  }
  func.func @transform_5(%arg0: i32) -> (i32, i32) {
    %c0_i32 = arith.constant 0 : i32
    %c0_i32_0 = arith.constant 0 : i32
    %c0_i32_1 = arith.constant 0 : i32
    return %c0_i32, %c0_i32_0 : i32, i32
  }
  func.func @transform_6(%arg0: i32) -> (i32, i32) {
    %c0_i32 = arith.constant 0 : i32
    %c0_i32_0 = arith.constant 0 : i32
    %c0_i32_1 = arith.constant 0 : i32
    return %c0_i32, %c0_i32_0 : i32, i32
  }
  func.func @transform_7(%arg0: i32) -> (i32, i32) {
    %c0_i32 = arith.constant 0 : i32
    %c0_i32_0 = arith.constant 0 : i32
    return %arg0, %c0_i32 : i32, i32
  }
}

module attributes {stable_mosaic.version = 11 : i64} {
  func.func @_fused_mlp_kernel(%arg0: i32, %arg1: memref<16x128xbf16, #tpu.memory_space<vmem>>, %arg2: memref<128x128xbf16, #tpu.memory_space<vmem>>, %arg3: memref<1x128xf32, #tpu.memory_space<vmem>>, %arg4: memref<128x128xbf16, #tpu.memory_space<vmem>>, %arg5: memref<1x128xf32, #tpu.memory_space<vmem>>, %arg6: memref<128x128xbf16, #tpu.memory_space<vmem>>, %arg7: memref<1x128xf32, #tpu.memory_space<vmem>>, %arg8: memref<16x128xf32, #tpu.memory_space<vmem>>) attributes {dimension_semantics = [#tpu.dimension_semantics<parallel>], iteration_bounds = array<i64: 1>, scalar_prefetch = 0 : i64, scratch_operands = 0 : i64, tpu.core_type = #tpu.core_type<tc>, window_params = [{transform_indices = @transform_0, window_bounds = array<i64: 16, 128>}, {pipeline_mode = #tpu.pipeline_mode<synchronous>, transform_indices = @transform_1, window_bounds = array<i64: 128, 128>}, {pipeline_mode = #tpu.pipeline_mode<synchronous>, transform_indices = @transform_2, window_bounds = array<i64: 1, 128>}, {pipeline_mode = #tpu.pipeline_mode<synchronous>, transform_indices = @transform_3, window_bounds = array<i64: 128, 128>}, {pipeline_mode = #tpu.pipeline_mode<synchronous>, transform_indices = @transform_4, window_bounds = array<i64: 1, 128>}, {pipeline_mode = #tpu.pipeline_mode<synchronous>, transform_indices = @transform_5, window_bounds = array<i64: 128, 128>}, {pipeline_mode = #tpu.pipeline_mode<synchronous>, transform_indices = @transform_6, window_bounds = array<i64: 1, 128>}, {transform_indices = @transform_7, window_bounds = array<i64: 16, 128>}]} {
    %c0 = arith.constant 0 : index
    %c0_0 = arith.constant 0 : index
    %0 = vector.load %arg1[%c0, %c0_0] : memref<16x128xbf16, #tpu.memory_space<vmem>>, vector<16x128xbf16>
    %c0_1 = arith.constant 0 : index
    %c0_2 = arith.constant 0 : index
    %1 = vector.load %arg2[%c0_1, %c0_2] : memref<128x128xbf16, #tpu.memory_space<vmem>>, vector<128x128xbf16>
    %c0_3 = arith.constant 0 : index
    %c0_4 = arith.constant 0 : index
    %2 = vector.load %arg3[%c0_3, %c0_4] : memref<1x128xf32, #tpu.memory_space<vmem>>, vector<1x128xf32>
    %cst = arith.constant dense<0.000000e+00> : vector<16x128xf32>
    %3 = tpu.matmul %0, %1, %cst {dimension_numbers = #tpu.dot_dimension_numbers<[1], [0], [0], [1], [0, 0, 1, 1], [], []>} : vector<16x128xbf16>, vector<128x128xbf16>, vector<16x128xf32> -> vector<16x128xf32>
    %4 = vector.broadcast %2 : vector<1x128xf32> to vector<16x128xf32>
    %5 = arith.addf %3, %4 : vector<16x128xf32>
    %cst_5 = arith.constant 0.00999999977 : f32
    %6 = vector.broadcast %cst_5 : f32 to vector<16x128xf32>
    %7 = arith.mulf %6, %5 : vector<16x128xf32>
    %8 = arith.maximumf %5, %7 : vector<16x128xf32>
    %9 = arith.truncf %8 : vector<16x128xf32> to vector<16x128xbf16>
    %c0_6 = arith.constant 0 : index
    %c0_7 = arith.constant 0 : index
    %10 = vector.load %arg4[%c0_6, %c0_7] : memref<128x128xbf16, #tpu.memory_space<vmem>>, vector<128x128xbf16>
    %c0_8 = arith.constant 0 : index
    %c0_9 = arith.constant 0 : index
    %11 = vector.load %arg5[%c0_8, %c0_9] : memref<1x128xf32, #tpu.memory_space<vmem>>, vector<1x128xf32>
    %cst_10 = arith.constant dense<0.000000e+00> : vector<16x128xf32>
    %12 = tpu.matmul %9, %10, %cst_10 {dimension_numbers = #tpu.dot_dimension_numbers<[1], [0], [0], [1], [0, 0, 1, 1], [], []>} : vector<16x128xbf16>, vector<128x128xbf16>, vector<16x128xf32> -> vector<16x128xf32>
    %13 = vector.broadcast %11 : vector<1x128xf32> to vector<16x128xf32>
    %14 = arith.addf %12, %13 : vector<16x128xf32>
    %cst_11 = arith.constant 0.00999999977 : f32
    %15 = vector.broadcast %cst_11 : f32 to vector<16x128xf32>
    %16 = arith.mulf %15, %14 : vector<16x128xf32>
    %17 = arith.maximumf %14, %16 : vector<16x128xf32>
    %18 = arith.truncf %17 : vector<16x128xf32> to vector<16x128xbf16>
    %c0_12 = arith.constant 0 : index
    %c0_13 = arith.constant 0 : index
    %19 = vector.load %arg6[%c0_12, %c0_13] : memref<128x128xbf16, #tpu.memory_space<vmem>>, vector<128x128xbf16>
    %c0_14 = arith.constant 0 : index
    %c0_15 = arith.constant 0 : index
    %20 = vector.load %arg7[%c0_14, %c0_15] : memref<1x128xf32, #tpu.memory_space<vmem>>, vector<1x128xf32>
    %cst_16 = arith.constant dense<0.000000e+00> : vector<16x128xf32>
    %21 = tpu.matmul %18, %19, %cst_16 {dimension_numbers = #tpu.dot_dimension_numbers<[1], [0], [0], [1], [0, 0, 1, 1], [], []>} : vector<16x128xbf16>, vector<128x128xbf16>, vector<16x128xf32> -> vector<16x128xf32>
    %22 = vector.broadcast %20 : vector<1x128xf32> to vector<16x128xf32>
    %23 = arith.addf %21, %22 : vector<16x128xf32>
    %24 = arith.negf %23 : vector<16x128xf32>
    %25 = math.exp %24 : vector<16x128xf32>
    %cst_17 = arith.constant 1.000000e+00 : f32
    %26 = vector.broadcast %cst_17 : f32 to vector<16x128xf32>
    %27 = arith.addf %26, %25 : vector<16x128xf32>
    %28 = arith.divf %26, %27 : vector<16x128xf32>
    %c0_18 = arith.constant 0 : index
    %c0_19 = arith.constant 0 : index
    %29 = vector.load %arg8[%c0_18, %c0_19] : memref<16x128xf32, #tpu.memory_space<vmem>>, vector<16x128xf32>
    tpu.vector_store %arg8[%c0_18, %c0_19], %28 {strides = array<i32>} : memref<16x128xf32, #tpu.memory_space<vmem>>, vector<16x128xf32>,
    return
  }
  func.func @transform_0(%arg0: i32) -> (i32, i32) {
    %c0_i32 = arith.constant 0 : i32
    %c0_i32_0 = arith.constant 0 : i32
    return %arg0, %c0_i32 : i32, i32
  }
  func.func @transform_1(%arg0: i32) -> (i32, i32) {
    %c0_i32 = arith.constant 0 : i32
    %c0_i32_0 = arith.constant 0 : i32
    %c0_i32_1 = arith.constant 0 : i32
    return %c0_i32, %c0_i32_0 : i32, i32
  }
  func.func @transform_2(%arg0: i32) -> (i32, i32) {
    %c0_i32 = arith.constant 0 : i32
    %c0_i32_0 = arith.constant 0 : i32
    %c0_i32_1 = arith.constant 0 : i32
    return %c0_i32, %c0_i32_0 : i32, i32
  }
  func.func @transform_3(%arg0: i32) -> (i32, i32) {
    %c0_i32 = arith.constant 0 : i32
    %c0_i32_0 = arith.constant 0 : i32
    %c0_i32_1 = arith.constant 0 : i32
    return %c0_i32, %c0_i32_0 : i32, i32
  }
  func.func @transform_4(%arg0: i32) -> (i32, i32) {
    %c0_i32 = arith.constant 0 : i32
    %c0_i32_0 = arith.constant 0 : i32
    %c0_i32_1 = arith.constant 0 : i32
    return %c0_i32, %c0_i32_0 : i32, i32
  }
  func.func @transform_5(%arg0: i32) -> (i32, i32) {
    %c0_i32 = arith.constant 0 : i32
    %c0_i32_0 = arith.constant 0 : i32
    %c0_i32_1 = arith.constant 0 : i32
    return %c0_i32, %c0_i32_0 : i32, i32
  }
  func.func @transform_6(%arg0: i32) -> (i32, i32) {
    %c0_i32 = arith.constant 0 : i32
    %c0_i32_0 = arith.constant 0 : i32
    %c0_i32_1 = arith.constant 0 : i32
    return %c0_i32, %c0_i32_0 : i32, i32
  }
  func.func @transform_7(%arg0: i32) -> (i32, i32) {
    %c0_i32 = arith.constant 0 : i32
    %c0_i32_0 = arith.constant 0 : i32
    return %arg0, %c0_i32 : i32, i32
  }
}

</mosaic_0001>

<bundles_post_ra>
// kernel: tpu_custom_call.1
= control target key start
LH: loop header
LB: loop body
LE: loop exit
PB: predicated region body
PF: predicated region fallthrough
CT: control target
= control target key end

     0   :  { %12 = vsyncpa [#allocation3], 0  ;;  %s763_s0 = inlined_call_operand.hbm [shape: bf16[16,128], index: 0, kind: input, shape index: {}]   ;;  %s764_s1 = inlined_call_operand.hbm [shape: bf16[128,128], index: 1, kind: input, shape index: {}]   ;;  %s765_s2 = inlined_call_operand.vmem [shape: f32[1,128], index: 2, kind: input, shape index: {}]   ;;  %s766_s3 = inlined_call_operand.hbm [shape: bf16[128,128], index: 3, kind: input, shape index: {}]   ;;  %s767_s4 = inlined_call_operand.vmem [shape: f32[1,128], index: 4, kind: input, shape index: {}]   ;;  %s768_s5 = inlined_call_operand.hbm [shape: bf16[128,128], index: 5, kind: input, shape index: {}]   ;;  %s769_s6 = inlined_call_operand.vmem [shape: f32[1,128], index: 6, kind: input, shape index: {}]   ;;  %s770_s7 = inlined_call_operand.hbm [shape: f32[16,128], index: 7, kind: output, shape index: {}]  }
   0x1   :  { %13 = vsyncpa [#allocation6], 0 }
   0x2   :  { %14 = vsyncpa [#allocation9], 0 }
   0x3   :  { %15 = vsyncpa [#allocation4], 0  ;;  %s33_s26 = sshll.u32 %s764_s1, 4  ;;  %s690_s27 = smov [#allocation5]   ;;  %s34_s26 = int_to_ptr.hbm [resolvable:$true] %s33_s26 }
   0x4   :  { %s35_s28 = sshll.u32 %s690_s27, 4  ;;  %s20_s8 = sshll.u32 %s763_s0, 4  ;;  %s36_s28 = int_to_ptr.vmem [resolvable:$true] %s35_s28  ;;  %s21_s8 = int_to_ptr.hbm [resolvable:$true] %s20_s8 }
   0x5   :  { %s691_s9 = smov 64   ;;  %s692_s10 = smov 4  }
   0x6   :  { %41 = dma.hbm_to_vmem [thread:$0]  %s34_s26, 1024, %s36_s28, [#allocation6], %s691_s9, %s691_s9, %s692_s10  }
   0x7   :  { %s693_s11 = smov [#allocation2]   ;;  %s48_s15 = sshll.u32 %s766_s3, 4  ;;  %s49_s15 = int_to_ptr.hbm [resolvable:$true] %s48_s15 }
   0x8   :  { %s22_s12 = sshll.u32 %s693_s11, 4  ;;  %s63_s17 = sshll.u32 %s768_s5, 4  ;;  %s23_s12 = int_to_ptr.vmem [resolvable:$true] %s22_s12  ;;  %s64_s17 = int_to_ptr.hbm [resolvable:$true] %s63_s17 }
   0x9   :  { %28 = dma.hbm_to_vmem [thread:$0]  %s21_s8, 128, %s23_s12, [#allocation3], %s691_s9, %s691_s9, %s692_s10  }
   0xa   :  { %s694_s18 = smov [#allocation7]   ;;  %s695_s0 = smov [#allocation8]  }
   0xb   :  { %s50_s19 = sshll.u32 %s694_s18, 4  ;;  %s65_s20 = sshll.u32 %s695_s0, 4  ;;  %s51_s19 = int_to_ptr.vmem [resolvable:$true] %s50_s19  ;;  %s66_s20 = int_to_ptr.vmem [resolvable:$true] %s65_s20 }
   0xc   :  { %56 = dma.hbm_to_vmem [thread:$0]  %s49_s15, 1024, %s51_s19, [#allocation6], %s691_s9, %s691_s9, %s692_s10  }
   0xd   :  { %71 = dma.hbm_to_vmem [thread:$0]  %s64_s17, 1024, %s66_s20, [#allocation9], %s691_s9, %s691_s9, %s692_s10  }
   0xe   :  { %682 = dma.done.wait [#allocation3], 128  }
   0xf   :  { %683 = vsyncadd [#allocation3], 4294967168 }
  0x10   :  { %684 = dma.done.wait [#allocation6], 2048  }
  0x11   :  { %685 = vsyncadd [#allocation6], 4294965248 }
  0x12   :  { %686 = dma.done.wait [#allocation9], 1024  }
  0x13   :  { %687 = vsyncadd [#allocation9], 4294966272  ;;  %v525_v0 = vld [vmem:[#allocation5 + $0x38] sm:$0xff]  ;;  %v524_v1 = vld [vmem:[#allocation5 + $0x30] sm:$0xff]  ;;  %s400_s26 = sshll.u32 %s770_s7, 4  ;;  %s697_s27 = smov 128   ;;  %s401_s26 = int_to_ptr.hbm [resolvable:$true] %s400_s26 }
  0x14   :  { %166 = vmatpush.bf16.msra.mxu0 %v525_v0  ;;  %v533_v2 = vld [vmem:[#allocation7 + $0x38] sm:$0xff]  ;;  %v532_v3 = vld [vmem:[#allocation7 + $0x30] sm:$0xff]  ;;  %v523_v4 = vld [vmem:[#allocation5 + $0x28] sm:$0xff]  ;;  %s698_s28 = smov 8  }
  0x15   :  { %253 = vmatpush.bf16.msra.mxu1 %v533_v2  ;;  %v531_v5 = vld [vmem:[#allocation7 + $0x28] sm:$0xff]  ;;  %v522_v6 = vld [vmem:[#allocation5 + $0x20] sm:$0xff]  ;;  %v521_v8 = vld [vmem:[#allocation5 + $0x18] sm:$0xff] }
  0x16   :  { %v530_v7 = vld [vmem:[#allocation7 + $0x20] sm:$0xff]  ;;  %v520_v9 = vld [vmem:[#allocation5 + $0x10] sm:$0xff]  ;;  %v519_v10 = vld [vmem:[#allocation5 + $0x8] sm:$0xff] }
  0x17   :  { %v518_v11 = vld [vmem:[#allocation5] sm:$0xff]  ;;  %v517_v12 = vld [vmem:[#allocation2] sm:$0xff]  ;;  %v528_v14 = vld [vmem:[#allocation7 + $0x10] sm:$0xff] }
  0x18   :  { %167 = vmatpush.bf16.msra.mxu0 %v524_v1  ;;  %v529_v13 = vld [vmem:[#allocation7 + $0x18] sm:$0xff]  ;;  %v527_v15 = vld [vmem:[#allocation7 + $0x8] sm:$0xff]  ;;  %v526_v16 = vld [vmem:[#allocation7] sm:$0xff] }
  0x19   :  { %254 = vmatpush.bf16.msra.mxu1 %v532_v3  ;;  %v541_v17 = vld [vmem:[#allocation8 + $0x38] sm:$0xff]  ;;  %v540_v18 = vld [vmem:[#allocation8 + $0x30] sm:$0xff]  ;;  %v539_v19 = vld [vmem:[#allocation8 + $0x28] sm:$0xff] }
  0x1a   :  { %340 = vmatpush.bf16.msra.mxu2 %v541_v17  ;;  %v538_v20 = vld [vmem:[#allocation8 + $0x20] sm:$0xff]  ;;  %v551_v22 = vld [vmem:[%s765_s2] ss:$0 sm:$0xff]  ;;  %v536_v32 = vld [vmem:[#allocation8 + $0x10] sm:$0xff] }
  0x1b   :  { %v537_v31 = vld [vmem:[#allocation8 + $0x18] sm:$0xff]  ;;  %v535_v33 = vld [vmem:[#allocation8 + $0x8] sm:$0xff]  ;;  %v534_v34 = vld [vmem:[#allocation8] sm:$0xff] }
  0x1c   :  { %168 = vmatpush.bf16.msra.mxu0 %v523_v4  ;;  %v552_v36 = vld [vmem:[%s767_s4] ss:$0 sm:$0xff]  ;;  %s696_s4 = smov [#allocation10]  }
  0x1d   :  { %255 = vmatpush.bf16.msra.mxu1 %v531_v5  ;;  %v553_v45 = vld [vmem:[%s769_s6] ss:$0 sm:$0xff]  ;;  %s398_s6 = sshll.u32 %s696_s4, 4  ;;  %s399_s6 = int_to_ptr.vmem [resolvable:$true] %s398_s6 }
  0x1e   :  { %341 = vmatpush.bf16.msra.mxu2 %v540_v18 }
  0x20   :  { %169 = vmatpush.bf16.msra.mxu0 %v522_v6 }
  0x21   :  { %256 = vmatpush.bf16.msra.mxu1 %v530_v7 }
  0x22   :  { %342 = vmatpush.bf16.msra.mxu2 %v539_v19 }
  0x24   :  { %170 = vmatpush.bf16.msra.mxu0 %v521_v8 }
  0x25   :  { %257 = vmatpush.bf16.msra.mxu1 %v529_v13 }
  0x26   :  { %343 = vmatpush.bf16.msra.mxu2 %v538_v20 }
  0x28   :  { %171 = vmatpush.bf16.msra.mxu0 %v520_v9 }
  0x29   :  { %258 = vmatpush.bf16.msra.mxu1 %v528_v14 }
  0x2a   :  { %344 = vmatpush.bf16.msra.mxu2 %v537_v31 }
  0x2c   :  { %172 = vmatpush.bf16.msra.mxu0 %v519_v10 }
  0x2d   :  { %259 = vmatpush.bf16.msra.mxu1 %v527_v15 }
  0x2e   :  { %345 = vmatpush.bf16.msra.mxu2 %v536_v32 }
  0x30   :  { %173 = vmatpush.bf16.msra.mxu0 %v518_v11 }
  0x31   :  { %260 = vmatpush.bf16.msra.mxu1 %v526_v16 }
  0x32   :  { %346 = vmatpush.bf16.msra.mxu2 %v535_v33 }
  0x33   :  { %174 = vmatmul.bf16.vlgmr.msra.gmra.mxu0 %v517_v12 }
  0x36   :  { %347 = vmatpush.bf16.msra.mxu2 %v534_v34 }
  0xb0   :  { %v175_v21 = vpop.f32.mrf.mxu0 }
  0xb1   :  { %v176_v23 = vadd.f32 %v551_v22, %v175_v21 }
  0xb3   :  { %v180_v25 = vmul.f32 0.01, %v176_v23 }
  0xb5   :  { %v182_v28 = vmax.f32 %v176_v23, %v180_v25 }
  0xb8   :  { %v177_v24 = vpop.f32.mrf.mxu0 }
  0xb9   :  { %v178_v26 = vadd.f32 %v551_v22, %v177_v24 }
  0xbb   :  { %v181_v27 = vmul.f32 0.01, %v178_v26 }
  0xbd   :  { %v183_v29 = vmax.f32 %v178_v26, %v181_v27 }
  0xbf   :  { %v184_v30 = vpack.c.bf16 %v183_v29, %v182_v28 }
  0xc1   :  { %261 = vmatmul.bf16.vlgmr.msra.gmra.mxu1 %v184_v30 }
 0x13e   :  { %v262_v35 = vpop.f32.mrf.mxu1 }
 0x13f   :  { %v263_v37 = vadd.f32 %v552_v36, %v262_v35 }
 0x141   :  { %v267_v39 = vmul.f32 0.01, %v263_v37 }
 0x143   :  { %v269_v42 = vmax.f32 %v263_v37, %v267_v39 }
 0x146   :  { %v264_v38 = vpop.f32.mrf.mxu1 }
 0x147   :  { %v265_v40 = vadd.f32 %v552_v36, %v264_v38 }
 0x149   :  { %v268_v41 = vmul.f32 0.01, %v265_v40 }
 0x14b   :  { %v270_v43 = vmax.f32 %v265_v40, %v268_v41 }
 0x14d   :  { %v271_v44 = vpack.c.bf16 %v270_v43, %v269_v42 }
 0x14f   :  { %348 = vmatmul.bf16.vlgmr.msra.gmra.mxu2 %v271_v44 }
 0x1d2   :  { %v349_v46 = vpop.f32.mrf.mxu2 }
 0x1d3   :  { %v350_v47 = vadd.f32 %v553_v45, %v349_v46 }
 0x1d5   :  { %v515_v48 = vmul.f32 -1.442695, %v350_v47 }
 0x1d7   :  { %554 = vpow2.f32 %v515_v48 }
 0x1da   :  { %v351_v49 = vpop.f32.mrf.mxu2 }
 0x1db   :  { %v352_v50 = vadd.f32 %v553_v45, %v351_v49 }
 0x1dd   :  { %v555_v51 = vpop.eup %554  ;;  %v516_v52 = vmul.f32 -1.442695, %v352_v50 }
 0x1de   :  { %v360_v53 = vadd.f32 1.0, %v555_v51 }
 0x1df   :  { %556 = vpow2.f32 %v516_v52 }
 0x1e0   :  { %558 = vrcp.f32 %v360_v53  ;;  %v373_v59 = vand.u32 2147483648, %v360_v53  ;;  %v371_v61 = vand.u32 2147483647, %v360_v53  ;;  %vm367_vm1 = vweird.f32 %v360_v53 }
 0x1e2   :  { %v374_v0 = vor.u32 1.1754944e-38, %v373_v59  ;;  %vm372_vm3 = vcmp.eq.f32.partialorder %v371_v61, 8.507059e+37 }
 0x1e5   :  { %v557_v54 = vpop.eup %556 }
 0x1e6   :  { %v559_v55 = vpop.eup %558  ;;  %v361_v56 = vadd.f32 1.0, %v557_v54 }
 0x1e7   :  { %v363_v57 = vmul.f32 %v559_v55, %v360_v53  ;;  %vm368_vm0 = vweird.f32 %v559_v55 }
 0x1e8   :  { %560 = vrcp.f32 %v361_v56  ;;  %vm369_vm2 = vmor %vm367_vm1, %vm368_vm0  ;;  %v388_v5 = vand.u32 2147483648, %v361_v56  ;;  %v386_v7 = vand.u32 2147483647, %v361_v56  ;;  %vm382_vm5 = vweird.f32 %v361_v56 }
 0x1e9   :  { %v364_v58 = vsub.f32 1.0, %v363_v57 }
 0x1ea   :  { %v389_v9 = vor.u32 1.1754944e-38, %v388_v5  ;;  %vm387_vm7 = vcmp.eq.f32.partialorder %v386_v7, 8.507059e+37 }
 0x1eb   :  { %v365_v60 = vmul.f32 %v559_v55, %v364_v58 }
 0x1ed   :  { %v366_v62 = vadd.f32 %v559_v55, %v365_v60 }
 0x1ee   :  { %v561_v63 = vpop.eup %560 }
 0x1ef   :  { %v378_v1 = vmul.f32 %v561_v63, %v361_v56  ;;  %v370_v2 = vsel %vm369_vm2, %v559_v55, %v366_v62  ;;  %vm383_vm4 = vweird.f32 %v561_v63 }
 0x1f0   :  { %v375_v3 = vsel %vm372_vm3, %v374_v0, %v370_v2  ;;  %vm384_vm6 = vmor %vm382_vm5, %vm383_vm4 }
 0x1f1   :  { %v379_v4 = vsub.f32 1.0, %v378_v1  ;;  %392 = vst [vmem:[#allocation10] sm:$0xff] %v375_v3 }
 0x1f3   :  { %v380_v6 = vmul.f32 %v561_v63, %v379_v4 }
 0x1f5   :  { %v381_v8 = vadd.f32 %v561_v63, %v380_v6 }
 0x1f7   :  { %v385_v10 = vsel %vm384_vm6, %v561_v63, %v381_v8 }
 0x1f8   :  { %v390_v11 = vsel %vm387_vm7, %v389_v9, %v385_v10 }
 0x1f9   :  { %393 = vst [vmem:[#allocation10 + $0x8] sm:$0xff] %v390_v11 }
 0x1fa   :  { %406 = dma.vmem_to_hbm [thread:$0]  %s399_s6, 256, %s401_s26, [#allocation4], %s697_s27, %s697_s27, %s698_s28  }
 0x1fb   :  { %688 = dma.done.wait [#allocation4], 256  }
 0x1fc   :  { %689 = vsyncadd [#allocation4], 4294967040 }
 0x1fd   :  { %411 = vsyncpa [#allocation3], 1 }
 0x1fe   :  { %412 = vsyncpa [#allocation6], 1 }
 0x1ff   :  { %413 = vsyncpa [#allocation9], 1 }
 0x200   :  { %414 = vsyncpa [#allocation4], 1 }

// kernel: tpu_custom_call.1
= control target key start
LH: loop header
LB: loop body
LE: loop exit
PB: predicated region body
PF: predicated region fallthrough
CT: control target
= control target key end

     0   :  { %12 = vsyncpa [#allocation3], 0  ;;  %s763_s0 = inlined_call_operand.hbm [shape: bf16[16,128], index: 0, kind: input, shape index: {}]   ;;  %s764_s1 = inlined_call_operand.hbm [shape: bf16[128,128], index: 1, kind: input, shape index: {}]   ;;  %s765_s2 = inlined_call_operand.vmem [shape: f32[1,128], index: 2, kind: input, shape index: {}]   ;;  %s766_s3 = inlined_call_operand.hbm [shape: bf16[128,128], index: 3, kind: input, shape index: {}]   ;;  %s767_s4 = inlined_call_operand.vmem [shape: f32[1,128], index: 4, kind: input, shape index: {}]   ;;  %s768_s5 = inlined_call_operand.hbm [shape: bf16[128,128], index: 5, kind: input, shape index: {}]   ;;  %s769_s6 = inlined_call_operand.vmem [shape: f32[1,128], index: 6, kind: input, shape index: {}]   ;;  %s770_s7 = inlined_call_operand.hbm [shape: f32[16,128], index: 7, kind: output, shape index: {}]  }
   0x1   :  { %13 = vsyncpa [#allocation6], 0 }
   0x2   :  { %14 = vsyncpa [#allocation9], 0 }
   0x3   :  { %15 = vsyncpa [#allocation4], 0  ;;  %s33_s26 = sshll.u32 %s764_s1, 4  ;;  %s690_s27 = smov [#allocation5]   ;;  %s34_s26 = int_to_ptr.hbm [resolvable:$true] %s33_s26 }
   0x4   :  { %s35_s28 = sshll.u32 %s690_s27, 4  ;;  %s20_s8 = sshll.u32 %s763_s0, 4  ;;  %s36_s28 = int_to_ptr.vmem [resolvable:$true] %s35_s28  ;;  %s21_s8 = int_to_ptr.hbm [resolvable:$true] %s20_s8 }
   0x5   :  { %s691_s9 = smov 64   ;;  %s692_s10 = smov 4  }
   0x6   :  { %41 = dma.hbm_to_vmem [thread:$0]  %s34_s26, 1024, %s36_s28, [#allocation6], %s691_s9, %s691_s9, %s692_s10  }
   0x7   :  { %s693_s11 = smov [#allocation2]   ;;  %s48_s15 = sshll.u32 %s766_s3, 4  ;;  %s49_s15 = int_to_ptr.hbm [resolvable:$true] %s48_s15 }
   0x8   :  { %s22_s12 = sshll.u32 %s693_s11, 4  ;;  %s63_s17 = sshll.u32 %s768_s5, 4  ;;  %s23_s12 = int_to_ptr.vmem [resolvable:$true] %s22_s12  ;;  %s64_s17 = int_to_ptr.hbm [resolvable:$true] %s63_s17 }
   0x9   :  { %28 = dma.hbm_to_vmem [thread:$0]  %s21_s8, 128, %s23_s12, [#allocation3], %s691_s9, %s691_s9, %s692_s10  }
   0xa   :  { %s694_s18 = smov [#allocation7]   ;;  %s695_s0 = smov [#allocation8]  }
   0xb   :  { %s50_s19 = sshll.u32 %s694_s18, 4  ;;  %s65_s20 = sshll.u32 %s695_s0, 4  ;;  %s51_s19 = int_to_ptr.vmem [resolvable:$true] %s50_s19  ;;  %s66_s20 = int_to_ptr.vmem [resolvable:$true] %s65_s20 }
   0xc   :  { %56 = dma.hbm_to_vmem [thread:$0]  %s49_s15, 1024, %s51_s19, [#allocation6], %s691_s9, %s691_s9, %s692_s10  }
   0xd   :  { %71 = dma.hbm_to_vmem [thread:$0]  %s64_s17, 1024, %s66_s20, [#allocation9], %s691_s9, %s691_s9, %s692_s10  }
   0xe   :  { %682 = dma.done.wait [#allocation3], 128  }
   0xf   :  { %683 = vsyncadd [#allocation3], 4294967168 }
  0x10   :  { %684 = dma.done.wait [#allocation6], 2048  }
  0x11   :  { %685 = vsyncadd [#allocation6], 4294965248 }
  0x12   :  { %686 = dma.done.wait [#allocation9], 1024  }
  0x13   :  { %687 = vsyncadd [#allocation9], 4294966272  ;;  %v525_v0 = vld [vmem:[#allocation5 + $0x38] sm:$0xff]  ;;  %v524_v1 = vld [vmem:[#allocation5 + $0x30] sm:$0xff]  ;;  %s400_s26 = sshll.u32 %s770_s7, 4  ;;  %s697_s27 = smov 128   ;;  %s401_s26 = int_to_ptr.hbm [resolvable:$true] %s400_s26 }
  0x14   :  { %166 = vmatpush.bf16.msra.mxu0 %v525_v0  ;;  %v533_v2 = vld [vmem:[#allocation7 + $0x38] sm:$0xff]  ;;  %v532_v3 = vld [vmem:[#allocation7 + $0x30] sm:$0xff]  ;;  %v523_v4 = vld [vmem:[#allocation5 + $0x28] sm:$0xff]  ;;  %s698_s28 = smov 8  }
  0x15   :  { %253 = vmatpush.bf16.msra.mxu1 %v533_v2  ;;  %v531_v5 = vld [vmem:[#allocation7 + $0x28] sm:$0xff]  ;;  %v522_v6 = vld [vmem:[#allocation5 + $0x20] sm:$0xff]  ;;  %v521_v8 = vld [vmem:[#allocation5 + $0x18] sm:$0xff] }
  0x16   :  { %v530_v7 = vld [vmem:[#allocation7 + $0x20] sm:$0xff]  ;;  %v520_v9 = vld [vmem:[#allocation5 + $0x10] sm:$0xff]  ;;  %v519_v10 = vld [vmem:[#allocation5 + $0x8] sm:$0xff] }
  0x17   :  { %v518_v11 = vld [vmem:[#allocation5] sm:$0xff]  ;;  %v517_v12 = vld [vmem:[#allocation2] sm:$0xff]  ;;  %v528_v14 = vld [vmem:[#allocation7 + $0x10] sm:$0xff] }
  0x18   :  { %167 = vmatpush.bf16.msra.mxu0 %v524_v1  ;;  %v529_v13 = vld [vmem:[#allocation7 + $0x18] sm:$0xff]  ;;  %v527_v15 = vld [vmem:[#allocation7 + $0x8] sm:$0xff]  ;;  %v526_v16 = vld [vmem:[#allocation7] sm:$0xff] }
  0x19   :  { %254 = vmatpush.bf16.msra.mxu1 %v532_v3  ;;  %v541_v17 = vld [vmem:[#allocation8 + $0x38] sm:$0xff]  ;;  %v540_v18 = vld [vmem:[#allocation8 + $0x30] sm:$0xff]  ;;  %v539_v19 = vld [vmem:[#allocation8 + $0x28] sm:$0xff] }
  0x1a   :  { %340 = vmatpush.bf16.msra.mxu2 %v541_v17  ;;  %v538_v20 = vld [vmem:[#allocation8 + $0x20] sm:$0xff]  ;;  %v551_v22 = vld [vmem:[%s765_s2] ss:$0 sm:$0xff]  ;;  %v536_v32 = vld [vmem:[#allocation8 + $0x10] sm:$0xff] }
  0x1b   :  { %v537_v31 = vld [vmem:[#allocation8 + $0x18] sm:$0xff]  ;;  %v535_v33 = vld [vmem:[#allocation8 + $0x8] sm:$0xff]  ;;  %v534_v34 = vld [vmem:[#allocation8] sm:$0xff] }
  0x1c   :  { %168 = vmatpush.bf16.msra.mxu0 %v523_v4  ;;  %v552_v36 = vld [vmem:[%s767_s4] ss:$0 sm:$0xff]  ;;  %s696_s4 = smov [#allocation10]  }
  0x1d   :  { %255 = vmatpush.bf16.msra.mxu1 %v531_v5  ;;  %v553_v45 = vld [vmem:[%s769_s6] ss:$0 sm:$0xff]  ;;  %s398_s6 = sshll.u32 %s696_s4, 4  ;;  %s399_s6 = int_to_ptr.vmem [resolvable:$true] %s398_s6 }
  0x1e   :  { %341 = vmatpush.bf16.msra.mxu2 %v540_v18 }
  0x20   :  { %169 = vmatpush.bf16.msra.mxu0 %v522_v6 }
  0x21   :  { %256 = vmatpush.bf16.msra.mxu1 %v530_v7 }
  0x22   :  { %342 = vmatpush.bf16.msra.mxu2 %v539_v19 }
  0x24   :  { %170 = vmatpush.bf16.msra.mxu0 %v521_v8 }
  0x25   :  { %257 = vmatpush.bf16.msra.mxu1 %v529_v13 }
  0x26   :  { %343 = vmatpush.bf16.msra.mxu2 %v538_v20 }
  0x28   :  { %171 = vmatpush.bf16.msra.mxu0 %v520_v9 }
  0x29   :  { %258 = vmatpush.bf16.msra.mxu1 %v528_v14 }
  0x2a   :  { %344 = vmatpush.bf16.msra.mxu2 %v537_v31 }
  0x2c   :  { %172 = vmatpush.bf16.msra.mxu0 %v519_v10 }
  0x2d   :  { %259 = vmatpush.bf16.msra.mxu1 %v527_v15 }
  0x2e   :  { %345 = vmatpush.bf16.msra.mxu2 %v536_v32 }
  0x30   :  { %173 = vmatpush.bf16.msra.mxu0 %v518_v11 }
  0x31   :  { %260 = vmatpush.bf16.msra.mxu1 %v526_v16 }
  0x32   :  { %346 = vmatpush.bf16.msra.mxu2 %v535_v33 }
  0x33   :  { %174 = vmatmul.bf16.vlgmr.msra.gmra.mxu0 %v517_v12 }
  0x36   :  { %347 = vmatpush.bf16.msra.mxu2 %v534_v34 }
  0xb0   :  { %v175_v21 = vpop.f32.mrf.mxu0 }
  0xb1   :  { %v176_v23 = vadd.f32 %v551_v22, %v175_v21 }
  0xb3   :  { %v180_v25 = vmul.f32 0.01, %v176_v23 }
  0xb5   :  { %v182_v28 = vmax.f32 %v176_v23, %v180_v25 }
  0xb8   :  { %v177_v24 = vpop.f32.mrf.mxu0 }
  0xb9   :  { %v178_v26 = vadd.f32 %v551_v22, %v177_v24 }
  0xbb   :  { %v181_v27 = vmul.f32 0.01, %v178_v26 }
  0xbd   :  { %v183_v29 = vmax.f32 %v178_v26, %v181_v27 }
  0xbf   :  { %v184_v30 = vpack.c.bf16 %v183_v29, %v182_v28 }
  0xc1   :  { %261 = vmatmul.bf16.vlgmr.msra.gmra.mxu1 %v184_v30 }
 0x13e   :  { %v262_v35 = vpop.f32.mrf.mxu1 }
 0x13f   :  { %v263_v37 = vadd.f32 %v552_v36, %v262_v35 }
 0x141   :  { %v267_v39 = vmul.f32 0.01, %v263_v37 }
 0x143   :  { %v269_v42 = vmax.f32 %v263_v37, %v267_v39 }
 0x146   :  { %v264_v38 = vpop.f32.mrf.mxu1 }
 0x147   :  { %v265_v40 = vadd.f32 %v552_v36, %v264_v38 }
 0x149   :  { %v268_v41 = vmul.f32 0.01, %v265_v40 }
 0x14b   :  { %v270_v43 = vmax.f32 %v265_v40, %v268_v41 }
 0x14d   :  { %v271_v44 = vpack.c.bf16 %v270_v43, %v269_v42 }
 0x14f   :  { %348 = vmatmul.bf16.vlgmr.msra.gmra.mxu2 %v271_v44 }
 0x1d2   :  { %v349_v46 = vpop.f32.mrf.mxu2 }
 0x1d3   :  { %v350_v47 = vadd.f32 %v553_v45, %v349_v46 }
 0x1d5   :  { %v515_v48 = vmul.f32 -1.442695, %v350_v47 }
 0x1d7   :  { %554 = vpow2.f32 %v515_v48 }
 0x1da   :  { %v351_v49 = vpop.f32.mrf.mxu2 }
 0x1db   :  { %v352_v50 = vadd.f32 %v553_v45, %v351_v49 }
 0x1dd   :  { %v555_v51 = vpop.eup %554  ;;  %v516_v52 = vmul.f32 -1.442695, %v352_v50 }
 0x1de   :  { %v360_v53 = vadd.f32 1.0, %v555_v51 }
 0x1df   :  { %556 = vpow2.f32 %v516_v52 }
 0x1e0   :  { %558 = vrcp.f32 %v360_v53  ;;  %v373_v59 = vand.u32 2147483648, %v360_v53  ;;  %v371_v61 = vand.u32 2147483647, %v360_v53  ;;  %vm367_vm1 = vweird.f32 %v360_v53 }
 0x1e2   :  { %v374_v0 = vor.u32 1.1754944e-38, %v373_v59  ;;  %vm372_vm3 = vcmp.eq.f32.partialorder %v371_v61, 8.507059e+37 }
 0x1e5   :  { %v557_v54 = vpop.eup %556 }
 0x1e6   :  { %v559_v55 = vpop.eup %558  ;;  %v361_v56 = vadd.f32 1.0, %v557_v54 }
 0x1e7   :  { %v363_v57 = vmul.f32 %v559_v55, %v360_v53  ;;  %vm368_vm0 = vweird.f32 %v559_v55 }
 0x1e8   :  { %560 = vrcp.f32 %v361_v56  ;;  %vm369_vm2 = vmor %vm367_vm1, %vm368_vm0  ;;  %v388_v5 = vand.u32 2147483648, %v361_v56  ;;  %v386_v7 = vand.u32 2147483647, %v361_v56  ;;  %vm382_vm5 = vweird.f32 %v361_v56 }
 0x1e9   :  { %v364_v58 = vsub.f32 1.0, %v363_v57 }
 0x1ea   :  { %v389_v9 = vor.u32 1.1754944e-38, %v388_v5  ;;  %vm387_vm7 = vcmp.eq.f32.partialorder %v386_v7, 8.507059e+37 }
 0x1eb   :  { %v365_v60 = vmul.f32 %v559_v55, %v364_v58 }
 0x1ed   :  { %v366_v62 = vadd.f32 %v559_v55, %v365_v60 }
 0x1ee   :  { %v561_v63 = vpop.eup %560 }
 0x1ef   :  { %v378_v1 = vmul.f32 %v561_v63, %v361_v56  ;;  %v370_v2 = vsel %vm369_vm2, %v559_v55, %v366_v62  ;;  %vm383_vm4 = vweird.f32 %v561_v63 }
 0x1f0   :  { %v375_v3 = vsel %vm372_vm3, %v374_v0, %v370_v2  ;;  %vm384_vm6 = vmor %vm382_vm5, %vm383_vm4 }
 0x1f1   :  { %v379_v4 = vsub.f32 1.0, %v378_v1  ;;  %392 = vst [vmem:[#allocation10] sm:$0xff] %v375_v3 }
 0x1f3   :  { %v380_v6 = vmul.f32 %v561_v63, %v379_v4 }
 0x1f5   :  { %v381_v8 = vadd.f32 %v561_v63, %v380_v6 }
 0x1f7   :  { %v385_v10 = vsel %vm384_vm6, %v561_v63, %v381_v8 }
 0x1f8   :  { %v390_v11 = vsel %vm387_vm7, %v389_v9, %v385_v10 }
 0x1f9   :  { %393 = vst [vmem:[#allocation10 + $0x8] sm:$0xff] %v390_v11 }
 0x1fa   :  { %406 = dma.vmem_to_hbm [thread:$0]  %s399_s6, 256, %s401_s26, [#allocation4], %s697_s27, %s697_s27, %s698_s28  }
 0x1fb   :  { %688 = dma.done.wait [#allocation4], 256  }
 0x1fc   :  { %689 = vsyncadd [#allocation4], 4294967040 }
 0x1fd   :  { %411 = vsyncpa [#allocation3], 1 }
 0x1fe   :  { %412 = vsyncpa [#allocation6], 1 }
 0x1ff   :  { %413 = vsyncpa [#allocation9], 1 }
 0x200   :  { %414 = vsyncpa [#allocation4], 1 }

</bundles_post_ra>
